<compile_context>
chip_gen: v6e
topology: v6e:2x2x1
jax: 0.10.0
libtpu: 0.0.40
codegen_flags: <defaults>
</compile_context>

<pallas_src>
import functools

import jax
import jax.numpy as jnp
from jax.experimental import pallas as pl
from jax.experimental.pallas import tpu as pltpu

_INV_SQRT2 = 0.7071067811865476
_ERF_CLAMP = 3.925724029541015625  # Eigen/XLA f32 erf clamp; |erf| == 1 to f32 beyond this.


def _erf_f32(x):
    """Eigen/XLA single-precision rational erf (mul/add/div only; ~1 ulp max error)."""
    x = jnp.clip(x, -_ERF_CLAMP, _ERF_CLAMP)
    x2 = x * x
    alpha = (-2.72614225801306e-10, 2.77068142495902e-08, -2.10102402082508e-06,
             -5.69250639462346e-05, -7.34990630326855e-04, -2.95459980854025e-03,
             -1.60960333262415e-02)
    beta = (-1.45660718464996e-05, -2.13374055278905e-04, -1.68282697438203e-03,
            -7.37332916720468e-03, -1.42647390514189e-02)
    p = alpha[0]
    for c in alpha[1:]:
        p = p * x2 + c
    p = x * p
    q = beta[0]
    for c in beta[1:]:
        q = q * x2 + c
    return p / q


def _gelu_exact(x):
    # Exact (erf-based) GELU, as torch nn.GELU() default.
    return 0.5 * x * (1.0 + _erf_f32(x * _INV_SQRT2))


def _pos_emb_kernel(x_ref, w1_ref, w2_ref, p_ref, o_ref, acc_ref):
    # Compute the batch-invariant (T, D) result exactly once (grid step 0) into the
    # persistent VMEM scratch; every later step only streams it back out.
    @pl.when(pl.program_id(0) == 0)
    def _():
        x = x_ref[...]                               # (T, D) positional rows
        p = p_ref[...]                               # packed rows: [b1, b2, gamma, beta]
        b1 = p[0:1, :]
        b2 = p[1:2, :]
        gamma = p[2:3, :]
        beta = p[3:4, :]

        # GeluFeedForward: Linear -> exact (erf) GELU -> Linear
        h = jnp.dot(x, w1_ref[...], preferred_element_type=jnp.float32) + b1
        h = _gelu_exact(h)
        y = jnp.dot(h, w2_ref[...], preferred_element_type=jnp.float32) + b2

        # LayerNorm over the embedding dim: eps=1e-5, biased variance (torch.nn.LayerNorm).
        mean = jnp.mean(y, axis=-1, keepdims=True)
        var = jnp.mean((y - mean) ** 2, axis=-1, keepdims=True)
        acc_ref[...] = (y - mean) * jax.lax.rsqrt(var + 1e-5) * gamma + beta

    # Streamed batch "repeat(b, 1, 1)": one (T, D) store per grid step; writeback of batch
    # i-1 overlaps step i via the standard double-buffered output pipeline.
    o_ref[...] = acc_ref[...].astype(o_ref.dtype)


@functools.partial(jax.jit, static_argnums=(0, 1))
def positional_embedding(b, t, emb_table, w1, b1, w2, b2, gamma, beta):
    # Embedding lookup of arange(t) is a contiguous slice of the table (wrapper glue).
    x = emb_table[:t]                                  # (T, D)
    d = emb_table.shape[1]

    # Pack the four (1, D) vectors into one (4, D) operand (single DMA descriptor).
    params = jnp.concatenate([b1, b2, gamma, beta], axis=0)

    cost = pl.CostEstimate(
        flops=2 * (2 * t * d * d),                     # two (T,D)x(D,D) matmuls (done once)
        transcendentals=0,                             # erf is a VPU polynomial, not EUP
        bytes_accessed=4 * (t * d + 2 * d * d + 4 * d + b * t * d),
    )

    const2 = lambda i: (0, 0)
    return pl.pallas_call(
        _pos_emb_kernel,
        out_shape=jax.ShapeDtypeStruct((b, t, d), jnp.float32),
        grid_spec=pltpu.PrefetchScalarGridSpec(
            num_scalar_prefetch=0,
            grid=(b,),                                 # stream the batch repeat, per-step store
            in_specs=[
                pl.BlockSpec((t, d), const2),          # x (positional rows), grid-invariant
                pl.BlockSpec((d, d), const2),          # w1 (D_in, D_out), pre-transposed
                pl.BlockSpec((d, d), const2),          # w2 (D_in, D_out), pre-transposed
                pl.BlockSpec((4, d), const2),          # packed [b1, b2, gamma, beta]
            ],
            out_specs=pl.BlockSpec((None, t, d), lambda i: (i, 0, 0)),
            scratch_shapes=[pltpu.VMEM((t, d), jnp.float32)],   # persistent (T,D) result
        ),
        compiler_params=pltpu.CompilerParams(
            # "arbitrary": compute-once scratch requires one core to walk the whole grid.
            # (v7x: switch to "parallel" + per-step recompute to use both TensorCores.)
            dimension_semantics=("arbitrary",),
            vmem_limit_bytes=32 * 1024 * 1024,
        ),
        cost_estimate=cost,
    )(x, w1, w2, params)


if __name__ == "__main__":
    # Small config consistent with the module: block_size=8, n_embed=32.
    block_size = 8
    n_embed = 32
    b, t = 2, 8

    key = jax.random.PRNGKey(0)
    k_emb, k_w1, k_b1, k_w2, k_b2 = jax.random.split(key, 5)

    # Deterministic parameter init (shapes per __init__). w1/w2 stored as (D_in, D_out);
    # torch nn.Linear weights ((out, in)) would need a transpose here.
    emb_table = jax.random.normal(k_emb, (block_size, n_embed), jnp.float32) * 0.02
    w1 = jax.random.normal(k_w1, (n_embed, n_embed), jnp.float32) * 0.02
    b1 = jax.random.normal(k_b1, (1, n_embed), jnp.float32) * 0.02
    w2 = jax.random.normal(k_w2, (n_embed, n_embed), jnp.float32) * 0.02
    b2 = jax.random.normal(k_b2, (1, n_embed), jnp.float32) * 0.02
    gamma = jnp.ones((1, n_embed), jnp.float32)        # LayerNorm weight
    beta = jnp.zeros((1, n_embed), jnp.float32)        # LayerNorm bias

    out = positional_embedding(b, t, emb_table, w1, b1, w2, b2, gamma, beta)
    out = jax.block_until_ready(out)

    # Pure-JAX reference (exact erf GELU, as torch nn.GELU default).
    x = emb_table[:t]
    h = jax.nn.gelu(x @ w1 + b1, approximate=False)
    y = h @ w2 + b2
    mean = jnp.mean(y, axis=-1, keepdims=True)
    var = jnp.mean((y - mean) ** 2, axis=-1, keepdims=True)
    ref = ((y - mean) * jax.lax.rsqrt(var + 1e-5)) * gamma + beta
    ref = jnp.broadcast_to(ref[None], (b, t, n_embed))

    assert out.shape == (b, t, n_embed), out.shape
    assert jnp.allclose(out, ref, atol=1e-5, rtol=1e-5)
    print("KERNEL_OK")
</pallas_src>

<mosaic_0001>
module attributes {stable_mosaic.version = 11 : i64} {
  func.func @_pos_emb_kernel(%arg0: i32, %arg1: memref<8x32xf32, #tpu.memory_space<vmem>>, %arg2: memref<32x32xf32, #tpu.memory_space<vmem>>, %arg3: memref<32x32xf32, #tpu.memory_space<vmem>>, %arg4: memref<4x32xf32, #tpu.memory_space<vmem>>, %arg5: memref<1x8x32xf32, #tpu.memory_space<vmem>>, %arg6: memref<8x32xf32, #tpu.memory_space<vmem>>) attributes {dimension_semantics = [#tpu.dimension_semantics<arbitrary>], iteration_bounds = array<i64: 2>, scalar_prefetch = 0 : i64, scratch_operands = 1 : i64, tpu.core_type = #tpu.core_type<tc>, window_params = [{pipeline_mode = #tpu.pipeline_mode<synchronous>, transform_indices = @transform_0, window_bounds = array<i64: 8, 32>}, {pipeline_mode = #tpu.pipeline_mode<synchronous>, transform_indices = @transform_1, window_bounds = array<i64: 32, 32>}, {pipeline_mode = #tpu.pipeline_mode<synchronous>, transform_indices = @transform_2, window_bounds = array<i64: 32, 32>}, {pipeline_mode = #tpu.pipeline_mode<synchronous>, transform_indices = @transform_3, window_bounds = array<i64: 4, 32>}, {transform_indices = @transform_4, window_bounds = array<i64: 1, 8, 32>}]} {
    %c0_i32 = arith.constant 0 : i32
    %0 = arith.cmpi eq, %arg0, %c0_i32 : i32
    %1 = arith.extui %0 : i1 to i32
    %c0_i32_0 = arith.constant 0 : i32
    %2 = arith.cmpi ne, %1, %c0_i32_0 : i32
    scf.if %2 {
      %c0_5 = arith.constant 0 : index
      %c0_6 = arith.constant 0 : index
      %7 = vector.load %arg1[%c0_5, %c0_6] : memref<8x32xf32, #tpu.memory_space<vmem>>, vector<8x32xf32>
      %c0_7 = arith.constant 0 : index
      %c0_8 = arith.constant 0 : index
      %8 = vector.load %arg4[%c0_7, %c0_8] : memref<4x32xf32, #tpu.memory_space<vmem>>, vector<4x32xf32>
      %9 = vector.extract_strided_slice %8 {offsets = [0, 0], sizes = [1, 32], strides = [1, 1]} : vector<4x32xf32> to vector<1x32xf32>
      %10 = vector.extract_strided_slice %8 {offsets = [1, 0], sizes = [1, 32], strides = [1, 1]} : vector<4x32xf32> to vector<1x32xf32>
      %11 = vector.extract_strided_slice %8 {offsets = [2, 0], sizes = [1, 32], strides = [1, 1]} : vector<4x32xf32> to vector<1x32xf32>
      %12 = vector.extract_strided_slice %8 {offsets = [3, 0], sizes = [1, 32], strides = [1, 1]} : vector<4x32xf32> to vector<1x32xf32>
      %c0_9 = arith.constant 0 : index
      %c0_10 = arith.constant 0 : index
      %13 = vector.load %arg2[%c0_9, %c0_10] : memref<32x32xf32, #tpu.memory_space<vmem>>, vector<32x32xf32>
      %cst = arith.constant dense<0.000000e+00> : vector<8x32xf32>
      %14 = tpu.matmul %7, %13, %cst {dimension_numbers = #tpu.dot_dimension_numbers<[1], [0], [0], [1], [0, 0, 1, 1], [], []>} : vector<8x32xf32>, vector<32x32xf32>, vector<8x32xf32> -> vector<8x32xf32>
      %15 = vector.broadcast %9 : vector<1x32xf32> to vector<8x32xf32>
      %16 = arith.addf %14, %15 : vector<8x32xf32>
      %cst_11 = arith.constant 5.000000e-01 : f32
      %17 = vector.broadcast %cst_11 : f32 to vector<8x32xf32>
      %18 = arith.mulf %17, %16 : vector<8x32xf32>
      %cst_12 = arith.constant 0.707106769 : f32
      %19 = vector.broadcast %cst_12 : f32 to vector<8x32xf32>
      %20 = arith.mulf %16, %19 : vector<8x32xf32>
      %cst_13 = arith.constant -3.92572403 : f32
      %cst_14 = arith.constant 3.92572403 : f32
      %21 = vector.broadcast %cst_13 : f32 to vector<8x32xf32>
      %22 = arith.maximumf %21, %20 : vector<8x32xf32>
      %23 = vector.broadcast %cst_14 : f32 to vector<8x32xf32>
      %24 = arith.minimumf %23, %22 : vector<8x32xf32>
      %25 = arith.mulf %24, %24 : vector<8x32xf32>
      %cst_15 = arith.constant -2.72614237E-10 : f32
      %26 = vector.broadcast %cst_15 : f32 to vector<8x32xf32>
      %27 = arith.mulf %26, %25 : vector<8x32xf32>
      %cst_16 = arith.constant 2.77068146E-8 : f32
      %28 = vector.broadcast %cst_16 : f32 to vector<8x32xf32>
      %29 = arith.addf %27, %28 : vector<8x32xf32>
      %30 = arith.mulf %29, %25 : vector<8x32xf32>
      %cst_17 = arith.constant -2.10102394E-6 : f32
      %31 = vector.broadcast %cst_17 : f32 to vector<8x32xf32>
      %32 = arith.addf %30, %31 : vector<8x32xf32>
      %33 = arith.mulf %32, %25 : vector<8x32xf32>
      %cst_18 = arith.constant -5.69250624E-5 : f32
      %34 = vector.broadcast %cst_18 : f32 to vector<8x32xf32>
      %35 = arith.addf %33, %34 : vector<8x32xf32>
      %36 = arith.mulf %35, %25 : vector<8x32xf32>
      %cst_19 = arith.constant -7.34990637E-4 : f32
      %37 = vector.broadcast %cst_19 : f32 to vector<8x32xf32>
      %38 = arith.addf %36, %37 : vector<8x32xf32>
      %39 = arith.mulf %38, %25 : vector<8x32xf32>
      %cst_20 = arith.constant -2.954600e-03 : f32
      %40 = vector.broadcast %cst_20 : f32 to vector<8x32xf32>
      %41 = arith.addf %39, %40 : vector<8x32xf32>
      %42 = arith.mulf %41, %25 : vector<8x32xf32>
      %cst_21 = arith.constant -0.0160960332 : f32
      %43 = vector.broadcast %cst_21 : f32 to vector<8x32xf32>
      %44 = arith.addf %42, %43 : vector<8x32xf32>
      %45 = arith.mulf %24, %44 : vector<8x32xf32>
      %cst_22 = arith.constant -1.45660715E-5 : f32
      %46 = vector.broadcast %cst_22 : f32 to vector<8x32xf32>
      %47 = arith.mulf %46, %25 : vector<8x32xf32>
      %cst_23 = arith.constant -2.13374049E-4 : f32
      %48 = vector.broadcast %cst_23 : f32 to vector<8x32xf32>
      %49 = arith.addf %47, %48 : vector<8x32xf32>
      %50 = arith.mulf %49, %25 : vector<8x32xf32>
      %cst_24 = arith.constant -0.00168282702 : f32
      %51 = vector.broadcast %cst_24 : f32 to vector<8x32xf32>
      %52 = arith.addf %50, %51 : vector<8x32xf32>
      %53 = arith.mulf %52, %25 : vector<8x32xf32>
      %cst_25 = arith.constant -0.00737332925 : f32
      %54 = vector.broadcast %cst_25 : f32 to vector<8x32xf32>
      %55 = arith.addf %53, %54 : vector<8x32xf32>
      %56 = arith.mulf %55, %25 : vector<8x32xf32>
      %cst_26 = arith.constant -0.0142647391 : f32
      %57 = vector.broadcast %cst_26 : f32 to vector<8x32xf32>
      %58 = arith.addf %56, %57 : vector<8x32xf32>
      %59 = arith.divf %45, %58 : vector<8x32xf32>
      %cst_27 = arith.constant 1.000000e+00 : f32
      %60 = vector.broadcast %cst_27 : f32 to vector<8x32xf32>
      %61 = arith.addf %60, %59 : vector<8x32xf32>
      %62 = arith.mulf %18, %61 : vector<8x32xf32>
      %c0_28 = arith.constant 0 : index
      %c0_29 = arith.constant 0 : index
      %63 = vector.load %arg3[%c0_28, %c0_29] : memref<32x32xf32, #tpu.memory_space<vmem>>, vector<32x32xf32>
      %cst_30 = arith.constant dense<0.000000e+00> : vector<8x32xf32>
      %64 = tpu.matmul %62, %63, %cst_30 {dimension_numbers = #tpu.dot_dimension_numbers<[1], [0], [0], [1], [0, 0, 1, 1], [], []>} : vector<8x32xf32>, vector<32x32xf32>, vector<8x32xf32> -> vector<8x32xf32>
      %65 = vector.broadcast %10 : vector<1x32xf32> to vector<8x32xf32>
      %66 = arith.addf %64, %65 : vector<8x32xf32>
      %cst_31 = arith.constant dense<0.000000e+00> : vector<8xf32>
      %67 = vector.multi_reduction <add>, %66, %cst_31 [1] : vector<8x32xf32> to vector<8xf32>
      %68 = vector.shape_cast %67 : vector<8xf32> to vector<8x1xf32>
      %cst_32 = arith.constant 3.200000e+01 : f32
      %69 = vector.broadcast %cst_32 : f32 to vector<8x1xf32>
      %70 = arith.divf %68, %69 : vector<8x1xf32>
      %71 = vector.broadcast %70 : vector<8x1xf32> to vector<8x32xf32>
      %72 = arith.subf %66, %71 : vector<8x32xf32>
      %73 = arith.mulf %72, %72 : vector<8x32xf32>
      %cst_33 = arith.constant dense<0.000000e+00> : vector<8xf32>
      %74 = vector.multi_reduction <add>, %73, %cst_33 [1] : vector<8x32xf32> to vector<8xf32>
      %75 = vector.shape_cast %74 : vector<8xf32> to vector<8x1xf32>
      %cst_34 = arith.constant 3.200000e+01 : f32
      %76 = vector.broadcast %cst_34 : f32 to vector<8x1xf32>
      %77 = arith.divf %75, %76 : vector<8x1xf32>
      %78 = vector.broadcast %70 : vector<8x1xf32> to vector<8x32xf32>
      %79 = arith.subf %66, %78 : vector<8x32xf32>
      %cst_35 = arith.constant 9.99999974E-6 : f32
      %80 = vector.broadcast %cst_35 : f32 to vector<8x1xf32>
      %81 = arith.addf %77, %80 : vector<8x1xf32>
      %82 = math.rsqrt %81 : vector<8x1xf32>
      %83 = vector.broadcast %82 : vector<8x1xf32> to vector<8x32xf32>
      %84 = arith.mulf %79, %83 : vector<8x32xf32>
      %85 = vector.broadcast %11 : vector<1x32xf32> to vector<8x32xf32>
      %86 = arith.mulf %84, %85 : vector<8x32xf32>
      %87 = vector.broadcast %12 : vector<1x32xf32> to vector<8x32xf32>
      %88 = arith.addf %86, %87 : vector<8x32xf32>
      %c0_36 = arith.constant 0 : index
      %c0_37 = arith.constant 0 : index
      %89 = vector.load %arg6[%c0_36, %c0_37] : memref<8x32xf32, #tpu.memory_space<vmem>>, vector<8x32xf32>
      tpu.vector_store %arg6[%c0_36, %c0_37], %88 {strides = array<i32>} : memref<8x32xf32, #tpu.memory_space<vmem>>, vector<8x32xf32>,
    } else {
    }
    %c0 = arith.constant 0 : index
    %c0_1 = arith.constant 0 : index
    %3 = vector.load %arg6[%c0, %c0_1] : memref<8x32xf32, #tpu.memory_space<vmem>>, vector<8x32xf32>
    %c0_2 = arith.constant 0 : index
    %c0_3 = arith.constant 0 : index
    %c0_4 = arith.constant 0 : index
    %4 = vector.load %arg5[%c0_2, %c0_3, %c0_4] : memref<1x8x32xf32, #tpu.memory_space<vmem>>, vector<1x8x32xf32>
    %5 = vector.shape_cast %4 : vector<1x8x32xf32> to vector<8x32xf32>
    %6 = vector.shape_cast %3 : vector<8x32xf32> to vector<1x8x32xf32>
    tpu.vector_store %arg5[%c0_2, %c0_3, %c0_4], %6 {strides = array<i32>} : memref<1x8x32xf32, #tpu.memory_space<vmem>>, vector<1x8x32xf32>,
    return
  }
  func.func @transform_0(%arg0: i32) -> (i32, i32) {
    %c0_i32 = arith.constant 0 : i32
    %c0_i32_0 = arith.constant 0 : i32
    %c0_i32_1 = arith.constant 0 : i32
    return %c0_i32, %c0_i32_0 : i32, i32
  }
  func.func @transform_1(%arg0: i32) -> (i32, i32) {
    %c0_i32 = arith.constant 0 : i32
    %c0_i32_0 = arith.constant 0 : i32
    %c0_i32_1 = arith.constant 0 : i32
    return %c0_i32, %c0_i32_0 : i32, i32
  }
  func.func @transform_2(%arg0: i32) -> (i32, i32) {
    %c0_i32 = arith.constant 0 : i32
    %c0_i32_0 = arith.constant 0 : i32
    %c0_i32_1 = arith.constant 0 : i32
    return %c0_i32, %c0_i32_0 : i32, i32
  }
  func.func @transform_3(%arg0: i32) -> (i32, i32) {
    %c0_i32 = arith.constant 0 : i32
    %c0_i32_0 = arith.constant 0 : i32
    %c0_i32_1 = arith.constant 0 : i32
    return %c0_i32, %c0_i32_0 : i32, i32
  }
  func.func @transform_4(%arg0: i32) -> (i32, i32, i32) {
    %c0_i32 = arith.constant 0 : i32
    %c0_i32_0 = arith.constant 0 : i32
    %c0_i32_1 = arith.constant 0 : i32
    return %arg0, %c0_i32, %c0_i32_0 : i32, i32, i32
  }
}

</mosaic_0001>

<bundles_post_ra>
// kernel: positional_embedding.1
= control target key start
LH: loop header
LB: loop body
LE: loop exit
PB: predicated region body
PF: predicated region fallthrough
CT: control target
= control target key end

     0   :  { %9 = vsyncpa [#allocation4], 0  ;;  %s934_s0 = inlined_call_operand.vmem [shape: f32[8,32], index: 0, kind: input, shape index: {}]   ;;  %s935_s1 = inlined_call_operand.hbm [shape: f32[32,32], index: 1, kind: input, shape index: {}]   ;;  %s936_s2 = inlined_call_operand.hbm [shape: f32[32,32], index: 2, kind: input, shape index: {}]   ;;  %s937_s3 = inlined_call_operand.vmem [shape: f32[4,32], index: 3, kind: input, shape index: {}]   ;;  %s938_s4 = inlined_call_operand.hbm [shape: f32[2,8,32], index: 4, kind: output, shape index: {}]  }
   0x1   :  { %10 = vsyncpa [#allocation7], 0 }
   0x2   :  { %11 = vsyncpa [#allocation5], 0 }
   0x3   :  { %13 = vsyncpa [#allocation5 + $0x1], 0  ;;  %s786_s15 = smov 0   ;;  %s788_s16 = smov 0  }
   0x4   :  { %s790_s17 = smov 0   ;;  %s792_s18 = smov 0  }
   0x5 LB: > { %s807_s19 = sadd.s32 4294967295, %s752_s18   ;;  %s516_s20 = sadd.s32 4294967294, %s752_s18   ;;  %s752_s18 = sphi %s792_s18, %s953_s18   ;;  %s748_s17 = sphi %s790_s17, %s952_s17   ;;  %s744_s16 = sphi %s788_s16, %s951_s16   ;;  %s740_s15 = sphi %s786_s15, %s950_s15  }
   0x6   : > { %s811_s21 = sadd.s32 1, %s752_s18   ;;  %s110_s22 = sadd.s32 1, %s748_s17 }
   0x7   : > { %s107_s23 = ssub.s32 %s752_s18, %s811_s21  ;;  %p120_p0 = scmp.ne.s32.totalorder %s748_s17, %s744_s16 }
   0x8   : > { %p108_p1 = scmp.eq.s32.totalorder %s107_s23, 0  ;;  %p121_p2 = scmp.eq.s32.totalorder %s807_s19, 1 }
   0x9   : > { %p126_p3 = scmp.ne.s32.totalorder %s744_s16, %s740_s15  ;;  %p127_p4 = scmp.eq.s32.totalorder %s516_s20, 1 }
   0xa   : > { %s822_s24 = scalar_select %p108_p1, %s748_s17, %s110_s22  }
   0xb   : > { %p824_p5 = por %p121_p2, %p120_p0  ;;  %p828_p6 = por %p127_p4, %p126_p3 }
   0xc   : > { %p517_p7 = scmp.ge.s32.totalorder %s752_s18, 1  ;;  %p134_p8 = scmp.lt.s32.totalorder %s752_s18, 3 }
   0xd   : > { %s941_s26 = scalar_select %p828_p6, 1, 0 }
   0xe   : > { %p939_p10 = scmp.eq.s32.totalorder %s807_s19, 0  ;;  %p836_p11 = pnand %p517_p7, %p134_p8 }
   0xf   : > { %s754_s28 = smov [#allocation3]   ;;  %s755_s5 = smov [#allocation6]  }
  0x10   : > { %s149_s29 = sshll.u32 %s754_s28, 4  ;;  %p574_p12 = pneg %p836_p11  ;;  %s150_s29 = int_to_ptr.vmem [resolvable:$true] %s149_s29 }
  0x11   : > { %s162_s6 = sshll.u32 %s755_s5, 4  ;;  %s643_s7 = scalar_lea.vmem %s150_s29, 512  ;;  %s163_s6 = int_to_ptr.vmem [resolvable:$true] %s162_s6 }
  0x12   : > { %p844_p13 = pnand %p939_p10, %p574_p12  ;;  %p644_p1 = scmp.ne.s32.totalorder %s150_s29, %s643_s7 }
  0x13   : > { %p651_p4 = scmp.lt.s32.totalorder %s150_s29, %s150_s29  ;;  %p652_p7 = scmp.lt.s32.totalorder %s643_s7, %s643_s7 }
  0x14   : > { %p634_p0 = pneg %p844_p13 }
  0x15   : > { %p653_p8 = por %p652_p7, %p651_p4 }
  0x16   : > { %p646_p2 = pnand %p644_p1, %p634_p0 }
  0x18   : > { %p647_p3 = pneg %p646_p2 }
  0x1a   : > { %p654_p12 = pnand %p653_p8, %p647_p3 }
  0x1c   : > { %657 = shalt.err (!%p654_p12)
}
  0x1d   : > { %s756_s8 = smov 128   ;;  %s757_s9 = smov 8  }
  0x1e   : > { %577 = dma.hbm_to_vmem [thread:$0]  (!%p844_p13), %s935_s1, 512, %s150_s29, [#allocation4], %s756_s8, %s756_s8, %s757_s9  }
  0x1f   : > { %s669_s12 = scalar_lea.vmem %s163_s6, 512  ;;  %p677_p10 = scmp.lt.s32.totalorder %s163_s6, %s163_s6 }
  0x20   : > { %p670_p9 = scmp.ne.s32.totalorder %s163_s6, %s669_s12  ;;  %p678_p6 = scmp.lt.s32.totalorder %s669_s12, %s669_s12 }
  0x22   : > { %p672_p1 = pnand %p670_p9, %p634_p0  ;;  %p679_p4 = por %p678_p6, %p677_p10 }
  0x24   : > { %p673_p2 = pneg %p672_p1 }
  0x26   : > { %p680_p3 = pnand %p679_p4, %p673_p2 }
  0x28   : > { %683 = shalt.err (!%p680_p3)
}
  0x29   : > { %580 = dma.hbm_to_vmem [thread:$0]  (!%p844_p13), %s936_s2, 512, %s163_s6, [#allocation7], %s756_s8, %s756_s8, %s757_s9  }
  0x2a   : > { %181 = sbr.rel (%p836_p11) target bundleno = 831 (0x33f), region = 36  ;;  %p944_p7 = scmp.eq.s32.totalorder (!%p836_p11), %s807_s19, 0 }
  0x2f   : > { %727 = dma.done.wait (%p944_p7), [#allocation4], 512   ;;  %p945_p9 = pmov %p944_p7 }
  0x30   : > { %p946_p0 = pmov %p944_p7 }
  0x31   : > { %729 = vsyncadd (%p945_p9), [#allocation4], 4294966784 }
  0x32   : > { %731 = dma.done.wait (%p946_p0), [#allocation7], 512   ;;  %p947_p6 = pmov %p946_p0 }
  0x33   : > { %s203_s20 = sand.u32 1, %s744_s16   ;;  %p948_p10 = scmp.ne.s32.totalorder %s807_s19, 0 }
  0x34   : > { %733 = vsyncadd (%p947_p6), [#allocation7], 4294966784  ;;  %s879_s22 = sshll.u32 %s203_s20, 3 }
  0x35   : > { %s205_s23 = scalar_lea.vmem [#allocation8], %s879_s22  ;;  %209 = sbr.rel (%p948_p10) target bundleno = 808 (0x328), region = 48 }
  0x3a   : > { %v215_v0 = vld [vmem:[#allocation3 + $0x18] sm:$0xff]  ;;  %v758_v1 = vmov 0.0   ;;  %v214_v2 = vld [vmem:[#allocation3 + $0x10] sm:$0xff]  ;;  %vm759_vm0 = vmmov 0   ;;  %v213_v3 = vld [vmem:[#allocation3 + $0x8] sm:$0xff]  ;;  %vm220_vm1 = vcmask 261120   ;;  %v216_v10 = vlaneseq }
  0x3b   : > { %542 = vmatprep.subr.mxu0 %v758_v1  ;;  %550 = vmatprep.mubr.msk.f32.mxu0 %vm759_vm0, %v758_v1  ;;  %v212_v4 = vld [vmem:[#allocation3] sm:$0xff]  ;;  %v210_v5 = vld [vmem:[%s934_s0] sm:$0xff]  ;;  %v326_v7 = vld [vmem:[#allocation6 + $0x10] sm:$0xff] }
  0x3c   : > { %543 = vmatpush3.msra.mxu0 %v215_v0  ;;  %553 = vmatprep.subr.mxu1 %v758_v1  ;;  %v327_v6 = vld [vmem:[#allocation6 + $0x18] sm:$0xff]  ;;  %v325_v8 = vld [vmem:[#allocation6 + $0x8] sm:$0xff]  ;;  %v324_v9 = vld [vmem:[#allocation6] sm:$0xff]  ;;  %v217_v11 = vshrl.u32 %v216_v10, 7 }
  0x3d   : > { %544 = vmatprep.subr.mxu0 %v758_v1  ;;  %561 = vmatprep.mubr.msk.f32.mxu1 %vm759_vm0, %v758_v1  ;;  %v211_v13 = vld [vmem:[%s937_s3] sm:$0xf] }
  0x3e   : > { %545 = vmatpush3.msra.mxu0 %v214_v2  ;;  %554 = vmatpush3.msra.mxu1 %v327_v6  ;;  %v218_v12 = vsub.s32 0, %v217_v11  ;;  %v330_v47 = vsub.s32 1, %v217_v11  ;;  %v421_v61 = vsub.s32 2, %v217_v11  ;;  %v426_v62 = vsub.s32 3, %v217_v11 }
  0x3f   : > { %546 = vmatprep.subr.mxu0 %v758_v1  ;;  %555 = vmatprep.subr.mxu1 %v758_v1 }
  0x40   : > { %547 = vmatpush3.msra.mxu0 %v213_v3  ;;  %556 = vmatpush3.msra.mxu1 %v326_v7  ;;  %v219_v14 = vrot.slane %v211_v13, %v218_v12  ;;  %v331_v48 = vrot.slane %v211_v13, %v330_v47  ;;  %v422_v63 = vrot.slane %v211_v13, %v421_v61 }
  0x41   : > { %548 = vmatprep.subr.mxu0 %v758_v1  ;;  %557 = vmatprep.subr.mxu1 %v758_v1 }
  0x42   : > { %549 = vmatpush3.msra.mxu0 %v212_v4  ;;  %558 = vmatpush3.msra.mxu1 %v325_v8 }
  0x43   : > { %551 = vmatmul.mubr.msk.f32.vlgmr.msra.gmra.mxu0 %vm220_vm1, %v210_v5  ;;  %559 = vmatprep.subr.mxu1 %v758_v1  ;;  %v427_v1 = vrot.slane %v211_v13, %v426_v62 }
  0x44   : > { %560 = vmatpush3.msra.mxu1 %v324_v9 }
 0x103   : > { %v290_v15 = vpop.f32.mrf.mxu0 }
 0x104   : > { %v291_v16 = vadd.f32 %v290_v15, %v219_v14 }
 0x105   : > { %v552_v17 = vpop.f32.mrf.mxu0 }
 0x106   : > { %v295_v18 = vmul.f32 0.70710677, %v291_v16  ;;  %v294_v44 = vmul.f32 0.5, %v291_v16 }
 0x108   : > { %v526_v19 = vclamps-f32 %v295_v18, 3.925724 }
 0x10a   : > { %v298_v20 = vmul.f32 %v526_v19, %v526_v19 }
 0x10c   : > { %v299_v21 = vmul.f32 -2.7261424e-10, %v298_v20  ;;  %v312_v22 = vmul.f32 -1.45660715e-05, %v298_v20 }
 0x10e   : > { %v300_v23 = vadd.f32 2.7706815e-08, %v299_v21  ;;  %v313_v24 = vadd.f32 -0.00021337405, %v312_v22 }
 0x110   : > { %v301_v25 = vmul.f32 %v300_v23, %v298_v20  ;;  %v314_v26 = vmul.f32 %v313_v24, %v298_v20 }
 0x112   : > { %v302_v27 = vadd.f32 -2.101024e-06, %v301_v25  ;;  %v315_v28 = vadd.f32 -0.001682827, %v314_v26 }
 0x114   : > { %v303_v29 = vmul.f32 %v302_v27, %v298_v20  ;;  %v316_v30 = vmul.f32 %v315_v28, %v298_v20 }
 0x116   : > { %v304_v31 = vadd.f32 -5.6925062e-05, %v303_v29  ;;  %v317_v32 = vadd.f32 -0.0073733293, %v316_v30 }
 0x118   : > { %v305_v33 = vmul.f32 %v304_v31, %v298_v20  ;;  %v318_v34 = vmul.f32 %v317_v32, %v298_v20 }
 0x11a   : > { %v306_v35 = vadd.f32 -0.00073499064, %v305_v33  ;;  %v319_v36 = vadd.f32 -0.014264739, %v318_v34 }
 0x11c   : > { %v307_v37 = vmul.f32 %v306_v35, %v298_v20  ;;  %628 = vrcp.f32 %v319_v36 }
 0x11e   : > { %v308_v38 = vadd.f32 -0.0029546, %v307_v37 }
 0x120   : > { %v309_v39 = vmul.f32 %v308_v38, %v298_v20 }
 0x122   : > { %v310_v40 = vadd.f32 -0.016096033, %v309_v39 }
 0x124   : > { %v311_v41 = vmul.f32 %v526_v19, %v310_v40 }
 0x129   : > { %v629_v42 = vpop.eup %628 }
 0x12a   : > { %v321_v43 = vmul.f32 %v629_v42, %v311_v41 }
 0x12c   : > { %v322_v45 = vadd.f32 1.0, %v321_v43 }
 0x12e   : > { %v323_v46 = vmul.f32 %v322_v45, %v294_v44 }
 0x130   : > { %562 = vmatmul.mubr.msk.f32.vlgmr.msra.gmra.mxu1 %vm220_vm1, %v323_v46 }
 0x1f0   : > { %v401_v49 = vpop.f32.mrf.mxu1 }
 0x1f1   : > { %v402_v50 = vadd.f32 %v401_v49, %v331_v48 }
 0x1f2   : > { %v563_v51 = vpop.f32.mrf.mxu1 }
 0x1f3   : > { %v405_v52 = vsel %vm220_vm1, %v402_v50, 0.0 }
 0x1f4   : > { %406 = vadd.xlane.f32.xlu0 %v405_v52 }
 0x27d   : > { %v407_v53 = vpop.xlane.xlu0 %406 }
 0x27e   : > { %v409_v54 = vmul.f32 0.03125, %v407_v53 }
 0x280   : > { %v410_v55 = vsub.f32 %v402_v50, %v409_v54 }
 0x282   : > { %v411_v56 = vmul.f32 %v410_v55, %v410_v55 }
 0x284   : > { %v412_v57 = vsel %vm220_vm1, %v411_v56, 0.0 }
 0x285   : > { %413 = vadd.xlane.f32.xlu0 %v412_v57 }
 0x30e   : > { %v414_v58 = vpop.xlane.xlu0 %413 }
 0x30f   : > { %v415_v59 = vmul.f32 0.03125, %v414_v58 }
 0x311   : > { %v416_v60 = vadd.f32 1e-05, %v415_v59 }
 0x313   : > { %630 = vrsqrt.f32 %v416_v60 }
 0x320   : > { %v631_v0 = vpop.eup %630 }
 0x321   : > { %v418_v2 = vmul.f32 %v631_v0, %v410_v55 }
 0x323   : > { %v423_v3 = vmul.f32 %v422_v63, %v418_v2 }
 0x325   : > { %v428_v4 = vadd.f32 %v427_v1, %v423_v3 }
 0x327   : > { %429 = vst.msk [vmem:[#allocation2] sm:$0xff] %vm220_vm1, %v428_v4 }
 0x328 PF: > { %vm431_vm2 = vcmask 261120   ;;  %s529_s5 = sshll.u32 %s807_s19, 7  ;;  %s447_s9 = sshll.u32 %s205_s23, 4  ;;  %s448_s9 = int_to_ptr.vmem [resolvable:$true] %s447_s9 }
 0x329   : > { %s445_s8 = scalar_lea.hbm %s938_s4, %s529_s5  ;;  %s434_s10 = scalar_lea.sflag [#allocation5], %s203_s20 }
 0x32a   : > { %s684_s11 = scalar_lea.vmem %s448_s9, 128  ;;  %s760_s12 = smov [#allocation8]  }
 0x32b   : > { %p685_p11 = scmp.ne.s32.totalorder %s448_s9, %s684_s11  ;;  %s688_s13 = sshll.u32 %s760_s12, 4  ;;  %s689_s13 = int_to_ptr.vmem [resolvable:$false] %s688_s13 }
 0x32c   : > { %s690_s19 = scalar_lea.vmem %s689_s13, 256  ;;  %p691_p12 = scmp.lt.s32.totalorder %s448_s9, %s689_s13 }
 0x32d   : > { %p686_p13 = pnand %p685_p11, %p824_p5  ;;  %p692_p1 = scmp.lt.s32.totalorder %s690_s19, %s684_s11 }
 0x32e   : > { %v430_v5 = vld [vmem:[#allocation2] sm:$0xff] }
 0x32f   : > { %432 = vst.msk [vmem:[%s205_s23] sm:$0xff] %vm431_vm2, %v430_v5  ;;  %p687_p8 = pneg %p686_p13  ;;  %p693_p2 = por %p692_p1, %p691_p12 }
 0x331   : > { %p694_p4 = pnand %p693_p2, %p687_p8 }
 0x333   : > { %697 = shalt.err (!%p694_p4)
}
 0x334   : > { %s698_s14 = scalar_lea.hbm %s445_s8, 128  ;;  %s702_s23 = scalar_lea.hbm %s938_s4, 256 }
 0x335   : > { %p699_p3 = scmp.ne.s32.totalorder %s445_s8, %s698_s14  ;;  %p703_p0 = scmp.lt.s32.totalorder %s445_s8, %s938_s4 }
 0x336   : > { %p704_p6 = scmp.lt.s32.totalorder %s702_s23, %s698_s14 }
 0x337   : > { %p700_p7 = pnand %p699_p3, %p824_p5 }
 0x338   : > { %p705_p10 = por %p704_p6, %p703_p0 }
 0x339   : > { %p701_p9 = pneg %p700_p7 }
 0x33b   : > { %p706_p11 = pnand %p705_p10, %p701_p9 }
 0x33d   : > { %709 = shalt.err (!%p706_p11)
}
 0x33e   : > { %572 = dma.vmem_to_hbm [thread:$0]  (%p824_p5), %s448_s9, 128, %s445_s8, %s434_s10  }
 0x33f PF: > { %p589_p13 = scmp.ge.s32.totalorder %s752_s18, 2  ;;  %s459_s29 = sand.u32 1, %s740_s15  }
 0x340   : > { %p949_p8 = scmp.ne.s32.totalorder %s941_s26, 0  ;;  %s460_s30 = scalar_lea.sflag [#allocation5], %s459_s29 }
 0x342   : > { %p582_p12 = pnand %p589_p13, %p949_p8 }
 0x344   : > { %p583_p1 = pneg %p582_p12 }
 0x346   : > { %735 = dma.done.wait (%p583_p1), %s460_s30, 128  }
 0x347   : > { %737 = vsyncadd (%p583_p1), %s460_s30, 4294967168  ;;  %p16_p2 = scmp.ge.s32.totalorder %s811_s21, 4   ;;  %s950_s15 = smov %s744_s16 }
 0x348   : > { %s951_s16 = smov %s748_s17  ;;  %s952_s17 = smov %s822_s24 }
 0x349   : > { %s953_s18 = smov %s811_s21  ;;  %18 = sbr.rel (!%p16_p2) target bundleno = 5 (0x5), region = 81 }
 0x34e   :  { %465 = vsyncpa [#allocation4], 1 }
 0x34f   :  { %467 = vsyncpa [#allocation4 + $0x1], 1 }
 0x350   :  { %468 = vsyncpa [#allocation7], 1 }
 0x351   :  { %469 = vsyncpa [#allocation5], 1 }
 0x352   :  { %471 = vsyncpa [#allocation5 + $0x1], 1 }

</bundles_post_ra>
